<compile_context>
chip_gen: v6e
topology: v6e:2x2x1
jax: 0.10.0
libtpu: 0.0.40
codegen_flags: <defaults>
</compile_context>

<pallas_src>
import functools

import numpy as np

import jax
import jax.numpy as jnp
from jax.experimental import pallas as pl
from jax.experimental.pallas import tpu as pltpu


def _cdiv(a, b):
    return -(-a // b)


def _round_up(n, m):
    return _cdiv(n, m) * m


def _tv_partial_kernel(x_ref, mask_ref, o_ref, *, img_w):
    """Partial TV sums for one (blk, tile_hw) tile.

    x_ref    : (blk, tile_hw)  -- blk flattened (row-major) image chunks;
               tile_hw is a multiple of img_w, so no image row straddles tiles.
    mask_ref : (2, tile_hw) f32 -- precomputed validity masks
               (row 0: w-diff, row 1: h-diff).  Constant index_map => the
               block is fetched once, not per grid step.
    o_ref    : (1, 1, 8, 128) lane-dense partial-sum block;
               [...,0,0] = h partial, [...,0,1] = w partial, rest zero.
    """
    t = x_ref.shape[1]
    x = x_ref[...].astype(jnp.float32)   # in-kernel upcast (bf16 halves HBM traffic)

    # pltpu.roll == jnp.roll: roll(x, s)[i] = x[(i - s) % t], so shift = t - k
    # yields the "+k" neighbour.  Wrapped lanes are zeroed by the masks below.
    x_w = pltpu.roll(x, shift=t - 1, axis=1)        # neighbour along W
    x_h = pltpu.roll(x, shift=t - img_w, axis=1)    # neighbour along H

    dw = x_w - x
    dh = x_h - x

    mw = mask_ref[0:1, :]   # (1, t), broadcasts over sublanes
    mh = mask_ref[1:2, :]

    w_partial = jnp.sum(dw * dw * mw)
    h_partial = jnp.sum(dh * dh * mh)

    lane = jax.lax.broadcasted_iota(jnp.int32, (1, 1, 8, 128), 3)
    o_ref[...] = jnp.where(lane == 0, h_partial,
                           jnp.where(lane == 1, w_partial, 0.0))


def tv_loss(x, tv_loss_weight=1.0, images_per_block=None, target_tile_bytes=None):
    """Pallas TPU implementation of TVLoss.forward. x is NCHW."""
    B, C, H, W = x.shape
    N = B * C
    HW = H * W
    itemsize = x.dtype.itemsize

    # ---- generation-aware scoped-VMEM budget --------------------------------
    try:
        vmem_cap = int(pltpu.get_tpu_info().vmem_capacity_bytes)
    except Exception:
        vmem_cap = 64 * 1024 * 1024                 # conservative (v7x per-TC)
    # 64 MiB on v5e/v6e (128 MiB physical), 48 MiB on v7x (64 MiB physical).
    vmem_limit = min(64 * 1024 * 1024, (vmem_cap * 3) // 4)

    # Per-element working set: 2 pipeline buffers of the input tile plus the
    # in-kernel f32 copies (cast + rolled neighbours + diffs) ~= 4x f32.
    per_elem_bytes = 2 * itemsize + 4 * 4
    slack = 4 * 1024 * 1024                         # masks, outputs, misc
    max_tile_elems = max(8 * 128, (vmem_limit - slack) // per_elem_bytes)
    if target_tile_bytes is None:
        target_tile_bytes = 6 * 1024 * 1024         # amortize ~0.35us/step overhead
    target_elems = max(8 * 128, min(target_tile_bytes // itemsize, max_tile_elems))

    # ---- tiling over (B*C, H*W) ----------------------------------------------
    n_pad8 = _round_up(max(N, 1), 8)

    if 8 * HW > target_elems:
        # One 8-image slab already exceeds the tile budget: tile H*W as well.
        # th must divide H (tiles never split an image row) and th*W must be a
        # multiple of 128 (lane alignment of the non-final block dim).
        blk = 8                                     # images_per_block ignored here
        th = H
        for cand in range(1, H + 1):
            if H % cand:
                continue
            if (cand * W) % 128:
                continue
            if blk * cand * W <= target_elems:
                th = cand
        # TODO(synk): if no aligned divisor of H exists, th falls back to H and
        # a truly huge single image may still exceed the scoped-VMEM budget.
        num_hw_blocks = H // th
        n_pad = n_pad8
    else:
        num_hw_blocks = 1
        th = H
        if images_per_block is not None:
            blk = min(_round_up(max(int(images_per_block), 1), 8), n_pad8)
        else:
            max_nblocks = n_pad8 // 8
            want = _cdiv(n_pad8 * HW, target_elems)
            num_nb = min(max_nblocks, max(want, min(2, max_nblocks)))
            if num_nb % 2 and num_nb + 1 <= max_nblocks:
                num_nb += 1                          # even count => both v7x TCs busy
            blk = _round_up(_cdiv(n_pad8, num_nb), 8)
        n_pad = _round_up(n_pad8, blk)

    num_n_blocks = n_pad // blk
    tile_hw = th * W

    # ---- inputs --------------------------------------------------------------
    x_flat = x.reshape(N, HW)
    if n_pad != N:
        # Zero-padded rows contribute exactly 0 to both partial sums.
        x_flat = jnp.pad(x_flat, ((0, n_pad - N), (0, 0)))

    idx = np.arange(tile_hw)
    mask_w = (idx % W != W - 1).astype(np.float32)      # drop wrap at w == W-1
    mask_h = (idx < tile_hw - W).astype(np.float32)     # drop tile's last image row
    masks = jnp.asarray(np.stack([mask_w, mask_h]))     # (2, tile_hw)

    kernel = functools.partial(_tv_partial_kernel, img_w=W)

    partials = pl.pallas_call(
        kernel,
        out_shape=jax.ShapeDtypeStruct(
            (num_n_blocks, num_hw_blocks, 8, 128), jnp.float32),
        grid=(num_n_blocks, num_hw_blocks),
        in_specs=[
            pl.BlockSpec((blk, tile_hw), lambda i, j: (i, j)),
            pl.BlockSpec((2, tile_hw), lambda i, j: (0, 0)),   # fetched once
        ],
        out_specs=pl.BlockSpec((1, 1, 8, 128), lambda i, j: (i, j, 0, 0)),
        compiler_params=pltpu.CompilerParams(
            dimension_semantics=("parallel", "parallel"),
            vmem_limit_bytes=int(vmem_limit),
        ),
        cost_estimate=pl.CostEstimate(
            flops=8 * n_pad * HW,
            transcendentals=0,
            bytes_accessed=n_pad * HW * itemsize
            + 2 * tile_hw * 4
            + num_n_blocks * num_hw_blocks * 8 * 128 * 4,
        ),
    )(x_flat, masks)

    h_tv = jnp.sum(partials[:, :, 0, 0])
    w_tv = jnp.sum(partials[:, :, 0, 1])

    if num_hw_blocks > 1:
        # h-differences straddling an HW-tile boundary (image rows th*k-1, th*k):
        # a tiny static row-gather handled once in the wrapper, so the Pallas
        # grid stays fully parallel (no cross-step carry).
        rb = np.arange(th, H, th)
        hi = x[:, :, rb, :].astype(jnp.float32)
        lo = x[:, :, rb - 1, :].astype(jnp.float32)
        h_tv = h_tv + jnp.sum((hi - lo) ** 2)

    # NOTE: H == 1 or W == 1 divides by zero, matching the PyTorch original.
    count_h = float(C * (H - 1) * W)
    count_w = float(C * H * (W - 1))
    return tv_loss_weight * 2.0 * (h_tv / count_h + w_tv / count_w) / B


def _tv_loss_ref(x, tv_loss_weight=1.0):
    # Pure-JAX reference mirroring the PyTorch code (for verification).
    B, C, H, W = x.shape
    count_h = C * (H - 1) * W
    count_w = C * H * (W - 1)
    h_tv = jnp.sum((x[:, :, 1:, :] - x[:, :, : H - 1, :]) ** 2)
    w_tv = jnp.sum((x[:, :, :, 1:] - x[:, :, :, : W - 1]) ** 2)
    return tv_loss_weight * 2.0 * (h_tv / count_h + w_tv / count_w) / B


if __name__ == "__main__":
    # Primary check: small NCHW input consistent with the module's forward.
    key = jax.random.PRNGKey(0)
    x = jax.random.normal(key, (2, 4, 16, 16), dtype=jnp.float32)
    out = jax.block_until_ready(tv_loss(x, tv_loss_weight=1.0))
    ref = _tv_loss_ref(x, 1.0)
    assert jnp.allclose(out, ref, rtol=1e-4, atol=1e-5), (out, ref)

    # Grid > 1 along B*C + zero padding of the B*C axis.
    x2 = jax.random.normal(jax.random.PRNGKey(1), (3, 3, 8, 16), dtype=jnp.float32)
    out2 = jax.block_until_ready(tv_loss(x2, tv_loss_weight=0.5, images_per_block=8))
    ref2 = _tv_loss_ref(x2, 0.5)
    assert jnp.allclose(out2, ref2, rtol=1e-4, atol=1e-5), (out2, ref2)

    # Large-image path: H*W tiling (second grid axis) + boundary-row correction.
    x3 = jax.random.normal(jax.random.PRNGKey(2), (2, 1, 512, 512), dtype=jnp.float32)
    out3 = jax.block_until_ready(tv_loss(x3, tv_loss_weight=1.0))
    ref3 = _tv_loss_ref(x3, 1.0)
    assert jnp.allclose(out3, ref3, rtol=1e-3, atol=1e-5), (out3, ref3)

    print("KERNEL_OK")
</pallas_src>

<mosaic_0001>
module attributes {stable_mosaic.version = 11 : i64} {
  func.func @_tv_partial_kernel(%arg0: i32, %arg1: i32, %arg2: memref<8x256xf32, #tpu.memory_space<vmem>>, %arg3: memref<2x256xf32, #tpu.memory_space<vmem>>, %arg4: memref<1x1x8x128xf32, #tpu.memory_space<vmem>>) attributes {dimension_semantics = [#tpu.dimension_semantics<parallel>, #tpu.dimension_semantics<parallel>], iteration_bounds = array<i64: 1, 1>, scalar_prefetch = 0 : i64, scratch_operands = 0 : i64, tpu.core_type = #tpu.core_type<tc>, window_params = [{transform_indices = @transform_0, window_bounds = array<i64: 8, 256>}, {pipeline_mode = #tpu.pipeline_mode<synchronous>, transform_indices = @transform_1, window_bounds = array<i64: 2, 256>}, {transform_indices = @transform_2, window_bounds = array<i64: 1, 1, 8, 128>}]} {
    %c0 = arith.constant 0 : index
    %c0_0 = arith.constant 0 : index
    %0 = vector.load %arg2[%c0, %c0_0] : memref<8x256xf32, #tpu.memory_space<vmem>>, vector<8x256xf32>
    %c255_i32 = arith.constant 255 : i32
    %1 = tpu.dynamic_rotate %0 by %c255_i32 dim 1 : vector<8x256xf32>, i32 -> vector<8x256xf32>
    %c240_i32 = arith.constant 240 : i32
    %2 = tpu.dynamic_rotate %0 by %c240_i32 dim 1 : vector<8x256xf32>, i32 -> vector<8x256xf32>
    %3 = arith.subf %1, %0 : vector<8x256xf32>
    %4 = arith.subf %2, %0 : vector<8x256xf32>
    %c0_1 = arith.constant 0 : index
    %c0_2 = arith.constant 0 : index
    %5 = vector.load %arg3[%c0_1, %c0_2] : memref<2x256xf32, #tpu.memory_space<vmem>>, vector<1x256xf32>
    %c1 = arith.constant 1 : index
    %c0_3 = arith.constant 0 : index
    %6 = vector.load %arg3[%c1, %c0_3] : memref<2x256xf32, #tpu.memory_space<vmem>>, vector<1x256xf32>
    %7 = arith.mulf %3, %3 : vector<8x256xf32>
    %8 = vector.broadcast %5 : vector<1x256xf32> to vector<8x256xf32>
    %9 = arith.mulf %7, %8 : vector<8x256xf32>
    %10 = vector.shape_cast %9 : vector<8x256xf32> to vector<1x8x256xf32>
    %cst = arith.constant dense<0.000000e+00> : vector<1xf32>
    %11 = vector.multi_reduction <add>, %10, %cst [1, 2] : vector<1x8x256xf32> to vector<1xf32>
    %12 = vector.shape_cast %11 : vector<1xf32> to vector<1x1x1xf32>
    %13 = vector.extract %12[0, 0, 0] : f32 from vector<1x1x1xf32>
    %14 = arith.mulf %4, %4 : vector<8x256xf32>
    %15 = vector.broadcast %6 : vector<1x256xf32> to vector<8x256xf32>
    %16 = arith.mulf %14, %15 : vector<8x256xf32>
    %17 = vector.shape_cast %16 : vector<8x256xf32> to vector<1x8x256xf32>
    %cst_4 = arith.constant dense<0.000000e+00> : vector<1xf32>
    %18 = vector.multi_reduction <add>, %17, %cst_4 [1, 2] : vector<1x8x256xf32> to vector<1xf32>
    %19 = vector.shape_cast %18 : vector<1xf32> to vector<1x1x1xf32>
    %20 = vector.extract %19[0, 0, 0] : f32 from vector<1x1x1xf32>
    %21 = tpu.iota {dimensions = array<i32: 3>} : vector<1x1x8x128xi32>
    %c0_i32 = arith.constant 0 : i32
    %22 = vector.broadcast %c0_i32 : i32 to vector<1x1x8x128xi32>
    %23 = arith.cmpi eq, %21, %22 : vector<1x1x8x128xi32>
    %c1_i32 = arith.constant 1 : i32
    %24 = vector.broadcast %c1_i32 : i32 to vector<1x1x8x128xi32>
    %25 = arith.cmpi eq, %21, %24 : vector<1x1x8x128xi32>
    %cst_5 = arith.constant 0.000000e+00 : f32
    %26 = vector.broadcast %13 : f32 to vector<1x1x8x128xf32>
    %27 = vector.broadcast %cst_5 : f32 to vector<1x1x8x128xf32>
    %28 = arith.select %25, %26, %27 : vector<1x1x8x128xi1>, vector<1x1x8x128xf32>
    %29 = vector.broadcast %20 : f32 to vector<1x1x8x128xf32>
    %30 = arith.select %23, %29, %28 : vector<1x1x8x128xi1>, vector<1x1x8x128xf32>
    %c0_6 = arith.constant 0 : index
    %c0_7 = arith.constant 0 : index
    %c0_8 = arith.constant 0 : index
    %c0_9 = arith.constant 0 : index
    %31 = vector.load %arg4[%c0_6, %c0_7, %c0_8, %c0_9] : memref<1x1x8x128xf32, #tpu.memory_space<vmem>>, vector<1x1x8x128xf32>
    tpu.vector_store %arg4[%c0_6, %c0_7, %c0_8, %c0_9], %30 {strides = array<i32>} : memref<1x1x8x128xf32, #tpu.memory_space<vmem>>, vector<1x1x8x128xf32>,
    return
  }
  func.func @transform_0(%arg0: i32, %arg1: i32) -> (i32, i32) {
    %c0_i32 = arith.constant 0 : i32
    return %arg0, %arg1 : i32, i32
  }
  func.func @transform_1(%arg0: i32, %arg1: i32) -> (i32, i32) {
    %c0_i32 = arith.constant 0 : i32
    %c0_i32_0 = arith.constant 0 : i32
    %c0_i32_1 = arith.constant 0 : i32
    return %c0_i32, %c0_i32_0 : i32, i32
  }
  func.func @transform_2(%arg0: i32, %arg1: i32) -> (i32, i32, i32, i32) {
    %c0_i32 = arith.constant 0 : i32
    %c0_i32_0 = arith.constant 0 : i32
    %c0_i32_1 = arith.constant 0 : i32
    return %arg0, %arg1, %c0_i32, %c0_i32_0 : i32, i32, i32, i32
  }
}

</mosaic_0001>

<bundles_post_ra>
// kernel: tpu_custom_call.1
= control target key start
LH: loop header
LB: loop body
LE: loop exit
PB: predicated region body
PF: predicated region fallthrough
CT: control target
= control target key end

     0   :  { %7 = vsyncpa [#allocation3], 0  ;;  %s244_s0 = inlined_call_operand.hbm [shape: f32[8,256], index: 0, kind: input, shape index: {}]   ;;  %s245_s1 = inlined_call_operand.hbm [shape: f32[2,256], index: 1, kind: input, shape index: {}]   ;;  %s246_s2 = inlined_call_operand.hbm [shape: f32[1,1,8,128], index: 2, kind: output, shape index: {}]  }
   0x1   :  { %8 = vsyncpa [#allocation6], 0 }
   0x2   :  { %9 = vsyncpa [#allocation4], 0  ;;  %s209_s9 = smov [#allocation2]   ;;  %s210_s11 = smov [#allocation5]  }
   0x3   :  { %s16_s10 = sshll.u32 %s209_s9, 4  ;;  %s26_s12 = sshll.u32 %s210_s11, 4  ;;  %s17_s10 = int_to_ptr.vmem [resolvable:$true] %s16_s10  ;;  %s27_s12 = int_to_ptr.vmem [resolvable:$true] %s26_s12 }
   0x4   :  { %s151_s13 = scalar_lea.vmem %s17_s10, 256  ;;  %p156_p1 = scmp.lt.s32.totalorder %s17_s10, %s17_s10 }
   0x5   :  { %p152_p0 = scmp.ne.s32.totalorder %s17_s10, %s151_s13  ;;  %p157_p2 = scmp.lt.s32.totalorder %s151_s13, %s151_s13 }
   0x7   :  { %p158_p3 = por %p157_p2, %p156_p1 }
   0x9   :  { %p159_p4 = pnand %p158_p3, %p152_p0 }
   0xb   :  { %162 = shalt.err (!%p159_p4)
}
   0xc   :  { %19 = dma.hbm_to_vmem [thread:$0]  %s244_s0, 256, %s17_s10, [#allocation3]  }
   0xd   :  { %s171_s16 = scalar_lea.vmem %s27_s12, 64  ;;  %p176_p6 = scmp.lt.s32.totalorder %s27_s12, %s27_s12 }
   0xe   :  { %p172_p5 = scmp.ne.s32.totalorder %s27_s12, %s171_s16  ;;  %p177_p7 = scmp.lt.s32.totalorder %s171_s16, %s171_s16 }
  0x10   :  { %p178_p8 = por %p177_p7, %p176_p6 }
  0x12   :  { %p179_p9 = pnand %p178_p8, %p172_p5 }
  0x14   :  { %182 = shalt.err (!%p179_p9)
}
  0x15   :  { %29 = dma.hbm_to_vmem [thread:$0]  %s245_s1, 64, %s27_s12, [#allocation6]  }
  0x16   :  { %203 = dma.done.wait [#allocation3], 256  }
  0x17   :  { %204 = vsyncadd [#allocation3], 4294967040 }
  0x18   :  { %205 = dma.done.wait [#allocation6], 64  }
  0x19   :  { %206 = vsyncadd [#allocation6], 4294967232  ;;  %v36_v0 = vld [vmem:[#allocation2] sm:$0xff]  ;;  %s211_s19 = smov 112   ;;  %s212_s20 = smov 127   ;;  %v37_v1 = vld [vmem:[#allocation2 + $0x8] sm:$0xff]  ;;  %v42_v2 = vlaneseq }
  0x1a   :  { %47 = vrot.lane.b32.xlu1 %v36_v0, %s211_s19  ;;  %38 = vrot.lane.b32.xlu0 %v36_v0, %s212_s20  ;;  %v60_v9 = vld [vmem:[#allocation5 + $0x1] ss:$2 sm:$0x3]  ;;  %v58_v10 = vld [vmem:[#allocation5] ss:$2 sm:$0x3] }
  0x1b   :  { %v65_v3 = vshrl.u32 %v42_v2, 7  ;;  %v235_v4 = vand.u32 127, %v42_v2  ;;  %s213_s0 = smov [#allocation7]  }
  0x1c   :  { %s124_s1 = sshll.u32 %s213_s0, 4  ;;  %s125_s1 = int_to_ptr.vmem [resolvable:$true] %s124_s1 }
  0x1d   :  { %v66_v7 = vsub.s32 0, %v65_v3  ;;  %v70_v8 = vsub.s32 1, %v65_v3  ;;  %vm51_vm0 = vcmp.lt.s32.totalorder %v235_v4, 112  ;;  %vm44_vm1 = vcmp.lt.s32.totalorder %v235_v4, 127  ;;  %s183_s23 = scalar_lea.vmem %s125_s1, 128  ;;  %p188_p11 = scmp.lt.s32.totalorder %s125_s1, %s125_s1 }
  0x1e   :  { %49 = vrot.lane.b32.xlu1 %v37_v1, %s211_s19  ;;  %40 = vrot.lane.b32.xlu0 %v37_v1, %s212_s20  ;;  %vm112_vm2 = vcmp.eq.s32.totalorder %v235_v4, 1  ;;  %vm111_vm3 = vcmp.eq.s32.totalorder %v235_v4, 0  ;;  %p184_p10 = scmp.ne.s32.totalorder %s125_s1, %s183_s23  ;;  %p189_p12 = scmp.lt.s32.totalorder %s183_s23, %s183_s23 }
  0x1f   :  { %v92_v13 = vrot.slane %v60_v9, %v66_v7  ;;  %v96_v14 = vrot.slane %v60_v9, %v70_v8  ;;  %v67_v15 = vrot.slane %v58_v10, %v66_v7  ;;  %v71_v16 = vrot.slane %v58_v10, %v70_v8 }
  0x20   :  { %p190_p13 = por %p189_p12, %p188_p11 }
  0x22   :  { %p191_p0 = pnand %p190_p13, %p184_p10 }
  0x8c   :  { %v48_v5 = vpop.permute.xlu1 %47  ;;  %v39_v6 = vpop.permute.xlu0 %38 }
  0x90   :  { %v50_v11 = vpop.permute.xlu1 %49  ;;  %v41_v12 = vpop.permute.xlu0 %40 }
  0x91   :  { %v52_v17 = vsel %vm51_vm0, %v48_v5, %v50_v11  ;;  %v53_v18 = vsel %vm51_vm0, %v50_v11, %v48_v5  ;;  %v45_v19 = vsel %vm44_vm1, %v39_v6, %v41_v12  ;;  %v46_v20 = vsel %vm44_vm1, %v41_v12, %v39_v6 }
  0x92   :  { %v56_v21 = vsub.f32 %v52_v17, %v36_v0  ;;  %v57_v22 = vsub.f32 %v53_v18, %v37_v1  ;;  %v54_v23 = vsub.f32 %v45_v19, %v36_v0  ;;  %v55_v24 = vsub.f32 %v46_v20, %v37_v1 }
  0x94   :  { %v86_v25 = vmul.f32 %v56_v21, %v56_v21  ;;  %v87_v26 = vmul.f32 %v57_v22, %v57_v22  ;;  %v61_v27 = vmul.f32 %v54_v23, %v54_v23  ;;  %v62_v28 = vmul.f32 %v55_v24, %v55_v24 }
  0x96   :  { %v99_v29 = vmul.f32 %v92_v13, %v86_v25  ;;  %v100_v30 = vmul.f32 %v96_v14, %v87_v26  ;;  %v74_v31 = vmul.f32 %v67_v15, %v61_v27  ;;  %v75_v32 = vmul.f32 %v71_v16, %v62_v28 }
  0x98   :  { %v101_v33 = vadd.f32 %v100_v30, %v99_v29  ;;  %v76_v34 = vadd.f32 %v75_v32, %v74_v31 }
  0x9a   :  { %102 = vadd.xlane.f32.xlu1 %v101_v33  ;;  %77 = vadd.xlane.f32.xlu0 %v76_v34 }
 0x123   :  { %v103_v35 = vpop.xlane.xlu1 %102  ;;  %v78_v36 = vpop.xlane.xlu0 %77 }
 0x124   :  { %v104_v37 = vrot.slane %v103_v35, 4  ;;  %v79_v38 = vrot.slane %v78_v36, 4 }
 0x126   :  { %v105_v39 = vadd.f32 %v104_v37, %v103_v35  ;;  %v80_v40 = vadd.f32 %v79_v38, %v78_v36 }
 0x128   :  { %v106_v41 = vrot.slane %v105_v39, 2  ;;  %v81_v42 = vrot.slane %v80_v40, 2 }
 0x12a   :  { %v107_v43 = vadd.f32 %v106_v41, %v105_v39  ;;  %v82_v44 = vadd.f32 %v81_v42, %v80_v40 }
 0x12c   :  { %v83_v45 = vrot.slane %v82_v44, 1  ;;  %v108_v46 = vrot.slane %v107_v43, 1 }
 0x12e   :  { %v84_v47 = vadd.f32 %v83_v45, %v82_v44  ;;  %v109_v48 = vadd.f32 %v108_v46, %v107_v43 }
 0x130   :  { %134 = vpush %v84_v47 }
 0x131   :  { %136 = vpush %v109_v48 }
 0x161   :  { %s135_s21 = spop %134 }
 0x162   :  { %v113_v49 = vstv %s135_s21  ;;  %s137_s22 = spop %136 }
 0x163   :  { %v114_v50 = vsel %vm112_vm2, %v113_v49, 0.0  ;;  %v115_v51 = vstv %s137_s22 }
 0x164   :  { %v116_v52 = vsel %vm111_vm3, %v115_v51, %v114_v50 }
 0x165   :  { %117 = vst [vmem:[#allocation7] sm:$0xff] %v116_v52 }
 0x166   :  { %194 = shalt.err (!%p191_p0)
}
 0x167   :  { %127 = dma.vmem_to_hbm [thread:$0]  %s125_s1, 128, %s246_s2, [#allocation4]  }
 0x168   :  { %207 = dma.done.wait [#allocation4], 128  }
 0x169   :  { %208 = vsyncadd [#allocation4], 4294967168 }
 0x16a   :  { %131 = vsyncpa [#allocation3], 1 }
 0x16b   :  { %132 = vsyncpa [#allocation6], 1 }
 0x16c   :  { %133 = vsyncpa [#allocation4], 1 }

</bundles_post_ra>
